<compile_context>
chip_gen: v7x
topology: tpu7x:2x2x1
jax: 0.10.0
libtpu: 0.0.40
codegen_flags: <defaults>
</compile_context>

<pallas_src>
import functools

import jax
import jax.numpy as jnp
from jax.experimental import pallas as pl
from jax.experimental.pallas import tpu as pltpu


def _round_up(x, m):
    return ((x + m - 1) // m) * m


def _cross_attention_kernel(x_ref, w_ref, b_ref, o1_ref, o2_ref, o3_ref, qkv_ref,
                            *, n, dp):
    i = pl.program_id(0)
    cdt = w_ref.dtype                     # MXU operand dtype (bf16 by default)

    # ---- Phase 1 (every grid step): projection for stream i -----------------
    # (n, dim) @ (dim, 3*dp), f32 accumulation, then one VPU broadcast bias add.
    y = jnp.dot(x_ref[0], w_ref[...], preferred_element_type=jnp.float32)
    qkv_ref[i] = y + b_ref[...]                                   # (n, 3*dp) f32

    # ---- Phase 2 (last grid step): attention + lane-dense output stores -----
    @pl.when(i == pl.num_programs(0) - 1)
    def _():
        def split(s):
            blk = qkv_ref[s]                                      # (n, 3*dp) f32
            return blk[:, 0:dp], blk[:, dp:2 * dp], blk[:, 2 * dp:3 * dp]

        q1, k1, v1 = split(0)
        q2, k2, v2 = split(1)
        q3, k3, v3 = split(2)

        def attend2(qa, qb, k, v):
            # Stack the two query blocks that share this K/V: one QK^T + one AV
            # matmul.  Fine at small n; move to a persistent scratch once tiled.
            qs = jnp.concatenate([qa, qb], axis=0).astype(cdt)    # (2n, dp)
            # Contract the LAST dim of both operands: MXU consumes k directly.
            dots = jax.lax.dot_general(
                qs, k.astype(cdt), (((1,), (1,)), ((), ())),
                preferred_element_type=jnp.float32)               # (2n, n) f32
            m = jnp.max(dots, axis=-1, keepdims=True)
            e = jnp.exp(dots - m)                                 # f32 softmax
            # Exact divide (the approx EUP reciprocal previously broke tolerance).
            p = e / jnp.sum(e, axis=-1, keepdims=True)
            o = jnp.dot(p.astype(cdt), v.astype(cdt),
                        preferred_element_type=jnp.float32)       # (2n, dp) f32
            return o[0:n], o[n:2 * n]

        out12, out13 = attend2(q2, q3, k1, v1)
        out21, out23 = attend2(q1, q3, k2, v2)
        out31, out32 = attend2(q1, q2, k3, v3)

        # Lane-aligned half writes; no concatenates, k added once per half.
        o1_ref[:, 0:dp] = (out21 + k1).astype(o1_ref.dtype)
        o1_ref[:, dp:2 * dp] = (out31 + k1).astype(o1_ref.dtype)
        o2_ref[:, 0:dp] = (out12 + k2).astype(o2_ref.dtype)
        o2_ref[:, dp:2 * dp] = (out32 + k2).astype(o2_ref.dtype)
        o3_ref[:, 0:dp] = (out13 + k3).astype(o3_ref.dtype)
        o3_ref[:, dp:2 * dp] = (out23 + k3).astype(o3_ref.dtype)


def pack_cross_attention_params(w1, b1, w2, b2, w3, b3, *, compute_dtype=jnp.bfloat16):
    """One-time (init-time) weight packing -- hoisted out of the per-call path.

    w*: (3*OUT_DIM, DIM) PyTorch nn.Linear layout, b*: (3*OUT_DIM,).
    Returns:
      w_packed: (DIM, 9*Dp) in compute_dtype   (per-stream column blocks of 3*Dp)
      b_packed: (1, 9*Dp) float32              (bias added in f32 on the VPU)
    with Dp = round_up(OUT_DIM, 128) so every q/k/v section is lane-aligned.
    """
    out_dim = w1.shape[0] // 3
    dp = _round_up(out_dim, 128)

    def pack_one(w, b):
        wt = jnp.asarray(w, jnp.float32).T            # (dim, 3*out_dim)
        bt = jnp.asarray(b, jnp.float32)
        wcols, bcols = [], []
        for s in range(3):
            wc = wt[:, s * out_dim:(s + 1) * out_dim]
            bc = bt[s * out_dim:(s + 1) * out_dim]
            wcols.append(jnp.pad(wc, ((0, 0), (0, dp - out_dim))))
            bcols.append(jnp.pad(bc, (0, dp - out_dim)))
        return jnp.concatenate(wcols, axis=1), jnp.concatenate(bcols)

    ws, bs = zip(*(pack_one(w, b) for w, b in ((w1, b1), (w2, b2), (w3, b3))))
    w_packed = jnp.concatenate(ws, axis=1).astype(compute_dtype)   # (dim, 9*dp)
    b_packed = jnp.concatenate(bs)[None, :].astype(jnp.float32)    # (1, 9*dp)
    return w_packed, b_packed


def cross_attention(t1, t2, t1c, w_packed, b_packed, *, out_dim):
    """Pallas wrapper.  t*: (N, DIM); packed params from pack_cross_attention_params.

    Returns three (1, N, 2*OUT_DIM) arrays (the module unsqueezes the batch dim).
    """
    n, dim = t1.shape
    dp = w_packed.shape[1] // 9
    compute_dtype = w_packed.dtype
    out_dtype = t1.dtype

    # One small stacked-activation op (blessed by the review); enables per-stream
    # DMA pipelining and bf16 activation transfer.
    x = jnp.stack([t1, t2, t1c], axis=0).astype(compute_dtype)     # (3, n, dim)

    grid_spec = pltpu.PrefetchScalarGridSpec(
        num_scalar_prefetch=0,
        grid=(3,),                                                 # one step / stream
        in_specs=[
            pl.BlockSpec((1, n, dim), lambda i: (i, 0, 0)),        # stream activations
            pl.BlockSpec((dim, 3 * dp), lambda i: (0, i)),         # stream weight cols
            pl.BlockSpec((1, 3 * dp), lambda i: (0, i)),           # stream biases
        ],
        out_specs=(
            pl.BlockSpec((n, 2 * dp), lambda i: (0, 0)),
            pl.BlockSpec((n, 2 * dp), lambda i: (0, 0)),
            pl.BlockSpec((n, 2 * dp), lambda i: (0, 0)),
        ),
        scratch_shapes=[pltpu.VMEM((3, n, 3 * dp), jnp.float32)],  # q/k/v, f32
    )

    o1, o2, o3 = pl.pallas_call(
        functools.partial(_cross_attention_kernel, n=n, dp=dp),
        out_shape=(jax.ShapeDtypeStruct((n, 2 * dp), out_dtype),
                   jax.ShapeDtypeStruct((n, 2 * dp), out_dtype),
                   jax.ShapeDtypeStruct((n, 2 * dp), out_dtype)),
        grid_spec=grid_spec,
        compiler_params=pltpu.CompilerParams(
            dimension_semantics=("arbitrary",)),                   # sequential streams
    )(x, w_packed, b_packed)

    def unpack(o):
        if dp == out_dim:
            r = o
        else:
            # Strip the lane padding of each half (cheap lane-aligned XLA slices).
            r = jnp.concatenate([o[:, :out_dim], o[:, dp:dp + out_dim]], axis=-1)
        return r[None]   # module unsqueezes the batch dim internally

    return unpack(o1), unpack(o2), unpack(o3)


def cross_attention_reference(t1, t2, t1c, w1, b1, w2, b2, w3, b3,
                              compute_dtype=jnp.float32):
    """Pure-JAX reference of the PyTorch forward (head=1).

    compute_dtype=float32 -> exact (HIGHEST precision) reference of the module.
    compute_dtype=bfloat16 -> mirrors the kernel's MXU operand rounding exactly
    (bf16 operands, f32 accumulation, f32 softmax) for a tight matched comparison.
    """
    out_dim = w1.shape[0] // 3
    hp = jax.lax.Precision.HIGHEST
    cast = lambda a: a.astype(compute_dtype)

    def proj(t, w, b):
        y = jax.lax.dot_general(cast(t), cast(w), (((1,), (1,)), ((), ())),
                                precision=hp, preferred_element_type=jnp.float32)
        y = y + b.astype(jnp.float32)
        return y[:, :out_dim], y[:, out_dim:2 * out_dim], y[:, 2 * out_dim:]

    q1, k1, v1 = proj(t1, w1, b1)
    q2, k2, v2 = proj(t2, w2, b2)
    q3, k3, v3 = proj(t1c, w3, b3)

    def attend(q, k, v):
        dots = jax.lax.dot_general(cast(q), cast(k), (((1,), (1,)), ((), ())),
                                   precision=hp, preferred_element_type=jnp.float32)
        p = jax.nn.softmax(dots, axis=-1)
        return jax.lax.dot_general(cast(p), cast(v), (((1,), (0,)), ((), ())),
                                   precision=hp, preferred_element_type=jnp.float32)

    out12 = attend(q2, k1, v1)
    out13 = attend(q3, k1, v1)
    out21 = attend(q1, k2, v2)
    out23 = attend(q3, k2, v2)
    out31 = attend(q1, k3, v3)
    out32 = attend(q2, k3, v3)

    r1 = jnp.concatenate([out21, out31], -1) + jnp.concatenate([k1, k1], -1)
    r2 = jnp.concatenate([out12, out32], -1) + jnp.concatenate([k2, k2], -1)
    r3 = jnp.concatenate([out13, out23], -1) + jnp.concatenate([k3, k3], -1)
    return r1[None], r2[None], r3[None]


if __name__ == "__main__":
    def run_case(n, dim, out_dim, compute_dtype, tol):
        key = jax.random.PRNGKey(0)
        keys = jax.random.split(key, 9)

        t1 = jax.random.normal(keys[0], (n, dim), dtype=jnp.float32)
        t2 = jax.random.normal(keys[1], (n, dim), dtype=jnp.float32)
        t1c = jax.random.normal(keys[2], (n, dim), dtype=jnp.float32)

        scale = 1.0 / jnp.sqrt(jnp.float32(dim))
        w1 = jax.random.normal(keys[3], (3 * out_dim, dim), dtype=jnp.float32) * scale
        w2 = jax.random.normal(keys[4], (3 * out_dim, dim), dtype=jnp.float32) * scale
        w3 = jax.random.normal(keys[5], (3 * out_dim, dim), dtype=jnp.float32) * scale
        b1 = jax.random.normal(keys[6], (3 * out_dim,), dtype=jnp.float32) * scale
        b2 = jax.random.normal(keys[7], (3 * out_dim,), dtype=jnp.float32) * scale
        b3 = jax.random.normal(keys[8], (3 * out_dim,), dtype=jnp.float32) * scale

        # Packing is hoisted: done once here ("init time"), reused by every call.
        w_packed, b_packed = pack_cross_attention_params(
            w1, b1, w2, b2, w3, b3, compute_dtype=compute_dtype)

        outs = cross_attention(t1, t2, t1c, w_packed, b_packed, out_dim=out_dim)
        outs = jax.block_until_ready(outs)

        # Matched-precision reference: same operand rounding as the kernel, so the
        # tolerance stays tight for both the bf16 and the f32 compute paths.
        refs = cross_attention_reference(t1, t2, t1c, w1, b1, w2, b2, w3, b3,
                                         compute_dtype=compute_dtype)

        for o, r in zip(outs, refs):
            assert o.shape == (1, n, 2 * out_dim), o.shape
            err = float(jnp.max(jnp.abs(o - r)))
            assert jnp.allclose(o, r, rtol=tol, atol=tol), err

    # Small shapes consistent with the module (dim=514, out_dim=256 scaled down).
    run_case(n=16, dim=96, out_dim=128, compute_dtype=jnp.bfloat16, tol=2e-2)
    run_case(n=8, dim=32, out_dim=16, compute_dtype=jnp.bfloat16, tol=2e-2)   # padded path
    run_case(n=16, dim=96, out_dim=128, compute_dtype=jnp.float32, tol=2e-2)  # full-precision path

    print("KERNEL_OK")
</pallas_src>

<mosaic_0001>
module attributes {stable_mosaic.version = 11 : i64} {
  func.func @_cross_attention_kernel(%arg0: i32, %arg1: memref<1x16x96xbf16, #tpu.memory_space<vmem>>, %arg2: memref<96x384xbf16, #tpu.memory_space<vmem>>, %arg3: memref<1x384xf32, #tpu.memory_space<vmem>>, %arg4: memref<16x256xf32, #tpu.memory_space<vmem>>, %arg5: memref<16x256xf32, #tpu.memory_space<vmem>>, %arg6: memref<16x256xf32, #tpu.memory_space<vmem>>, %arg7: memref<3x16x384xf32, #tpu.memory_space<vmem>>) attributes {dimension_semantics = [#tpu.dimension_semantics<arbitrary>], iteration_bounds = array<i64: 3>, scalar_prefetch = 0 : i64, scratch_operands = 1 : i64, tpu.core_type = #tpu.core_type<tc>, window_params = [{transform_indices = @transform_0, window_bounds = array<i64: 1, 16, 96>}, {transform_indices = @transform_1, window_bounds = array<i64: 96, 384>}, {transform_indices = @transform_2, window_bounds = array<i64: 1, 384>}, {pipeline_mode = #tpu.pipeline_mode<synchronous>, transform_indices = @transform_3, window_bounds = array<i64: 16, 256>}, {pipeline_mode = #tpu.pipeline_mode<synchronous>, transform_indices = @transform_4, window_bounds = array<i64: 16, 256>}, {pipeline_mode = #tpu.pipeline_mode<synchronous>, transform_indices = @transform_5, window_bounds = array<i64: 16, 256>}]} {
    %c0 = arith.constant 0 : index
    %c0_0 = arith.constant 0 : index
    %c0_1 = arith.constant 0 : index
    %0 = vector.load %arg1[%c0, %c0_0, %c0_1] : memref<1x16x96xbf16, #tpu.memory_space<vmem>>, vector<1x16x96xbf16>
    %1 = vector.shape_cast %0 : vector<1x16x96xbf16> to vector<16x96xbf16>
    %c0_2 = arith.constant 0 : index
    %c0_3 = arith.constant 0 : index
    %2 = vector.load %arg2[%c0_2, %c0_3] : memref<96x384xbf16, #tpu.memory_space<vmem>>, vector<96x384xbf16>
    %cst = arith.constant dense<0.000000e+00> : vector<16x384xf32>
    %3 = tpu.matmul %1, %2, %cst {dimension_numbers = #tpu.dot_dimension_numbers<[1], [0], [0], [1], [0, 0, 1, 1], [], []>} : vector<16x96xbf16>, vector<96x384xbf16>, vector<16x384xf32> -> vector<16x384xf32>
    %c0_4 = arith.constant 0 : index
    %c0_5 = arith.constant 0 : index
    %4 = vector.load %arg3[%c0_4, %c0_5] : memref<1x384xf32, #tpu.memory_space<vmem>>, vector<1x384xf32>
    %5 = vector.broadcast %4 : vector<1x384xf32> to vector<16x384xf32>
    %6 = arith.addf %3, %5 : vector<16x384xf32>
    %7 = arith.index_cast %arg0 : i32 to index
    %c0_6 = arith.constant 0 : index
    %c0_7 = arith.constant 0 : index
    %8 = vector.load %arg7[%7, %c0_6, %c0_7] : memref<3x16x384xf32, #tpu.memory_space<vmem>>, vector<1x16x384xf32>
    %9 = vector.shape_cast %8 : vector<1x16x384xf32> to vector<16x384xf32>
    %10 = vector.shape_cast %6 : vector<16x384xf32> to vector<1x16x384xf32>
    tpu.vector_store %arg7[%7, %c0_6, %c0_7], %10 {strides = array<i32>} : memref<3x16x384xf32, #tpu.memory_space<vmem>>, vector<1x16x384xf32>,
    %c2_i32 = arith.constant 2 : i32
    %11 = arith.cmpi eq, %arg0, %c2_i32 : i32
    %12 = arith.extui %11 : i1 to i32
    %c0_i32 = arith.constant 0 : i32
    %13 = arith.cmpi ne, %12, %c0_i32 : i32
    scf.if %13 {
      %c0_8 = arith.constant 0 : index
      %c0_9 = arith.constant 0 : index
      %c0_10 = arith.constant 0 : index
      %14 = vector.load %arg7[%c0_8, %c0_9, %c0_10] : memref<3x16x384xf32, #tpu.memory_space<vmem>>, vector<1x16x384xf32>
      %15 = vector.shape_cast %14 : vector<1x16x384xf32> to vector<16x384xf32>
      %16 = vector.extract_strided_slice %15 {offsets = [0, 0], sizes = [16, 128], strides = [1, 1]} : vector<16x384xf32> to vector<16x128xf32>
      %17 = vector.extract_strided_slice %15 {offsets = [0, 128], sizes = [16, 128], strides = [1, 1]} : vector<16x384xf32> to vector<16x128xf32>
      %18 = vector.extract_strided_slice %15 {offsets = [0, 256], sizes = [16, 128], strides = [1, 1]} : vector<16x384xf32> to vector<16x128xf32>
      %c1 = arith.constant 1 : index
      %c0_11 = arith.constant 0 : index
      %c0_12 = arith.constant 0 : index
      %19 = vector.load %arg7[%c1, %c0_11, %c0_12] : memref<3x16x384xf32, #tpu.memory_space<vmem>>, vector<1x16x384xf32>
      %20 = vector.shape_cast %19 : vector<1x16x384xf32> to vector<16x384xf32>
      %21 = vector.extract_strided_slice %20 {offsets = [0, 0], sizes = [16, 128], strides = [1, 1]} : vector<16x384xf32> to vector<16x128xf32>
      %22 = vector.extract_strided_slice %20 {offsets = [0, 128], sizes = [16, 128], strides = [1, 1]} : vector<16x384xf32> to vector<16x128xf32>
      %23 = vector.extract_strided_slice %20 {offsets = [0, 256], sizes = [16, 128], strides = [1, 1]} : vector<16x384xf32> to vector<16x128xf32>
      %c2 = arith.constant 2 : index
      %c0_13 = arith.constant 0 : index
      %c0_14 = arith.constant 0 : index
      %24 = vector.load %arg7[%c2, %c0_13, %c0_14] : memref<3x16x384xf32, #tpu.memory_space<vmem>>, vector<1x16x384xf32>
      %25 = vector.shape_cast %24 : vector<1x16x384xf32> to vector<16x384xf32>
      %26 = vector.extract_strided_slice %25 {offsets = [0, 0], sizes = [16, 128], strides = [1, 1]} : vector<16x384xf32> to vector<16x128xf32>
      %27 = vector.extract_strided_slice %25 {offsets = [0, 128], sizes = [16, 128], strides = [1, 1]} : vector<16x384xf32> to vector<16x128xf32>
      %28 = vector.extract_strided_slice %25 {offsets = [0, 256], sizes = [16, 128], strides = [1, 1]} : vector<16x384xf32> to vector<16x128xf32>
      %29 = tpu.concatenate %21, %26 in 0 : vector<16x128xf32>, vector<16x128xf32> -> vector<32x128xf32>
      %30 = arith.truncf %29 : vector<32x128xf32> to vector<32x128xbf16>
      %31 = arith.truncf %17 : vector<16x128xf32> to vector<16x128xbf16>
      %cst_15 = arith.constant dense<0.000000e+00> : vector<32x16xf32>
      %32 = tpu.matmul %30, %31, %cst_15 {dimension_numbers = #tpu.dot_dimension_numbers<[1], [1], [0], [0], [0, 0, 1, 0], [], []>} : vector<32x128xbf16>, vector<16x128xbf16>, vector<32x16xf32> -> vector<32x16xf32>
      %cst_16 = arith.constant dense<0xFF800000> : vector<32xf32>
      %33 = vector.multi_reduction <maximumf>, %32, %cst_16 [1] : vector<32x16xf32> to vector<32xf32>
      %34 = vector.shape_cast %33 : vector<32xf32> to vector<32x1xf32>
      %35 = vector.broadcast %34 : vector<32x1xf32> to vector<32x16xf32>
      %36 = arith.subf %32, %35 : vector<32x16xf32>
      %37 = math.exp %36 : vector<32x16xf32>
      %cst_17 = arith.constant dense<0.000000e+00> : vector<32xf32>
      %38 = vector.multi_reduction <add>, %37, %cst_17 [1] : vector<32x16xf32> to vector<32xf32>
      %39 = vector.shape_cast %38 : vector<32xf32> to vector<32x1xf32>
      %40 = vector.broadcast %39 : vector<32x1xf32> to vector<32x16xf32>
      %41 = arith.divf %37, %40 : vector<32x16xf32>
      %42 = arith.truncf %41 : vector<32x16xf32> to vector<32x16xbf16>
      %43 = arith.truncf %18 : vector<16x128xf32> to vector<16x128xbf16>
      %cst_18 = arith.constant dense<0.000000e+00> : vector<32x128xf32>
      %44 = tpu.matmul %42, %43, %cst_18 {dimension_numbers = #tpu.dot_dimension_numbers<[1], [0], [0], [1], [0, 0, 1, 1], [], []>} : vector<32x16xbf16>, vector<16x128xbf16>, vector<32x128xf32> -> vector<32x128xf32>
      %45 = vector.extract_strided_slice %44 {offsets = [0, 0], sizes = [16, 128], strides = [1, 1]} : vector<32x128xf32> to vector<16x128xf32>
      %46 = vector.extract_strided_slice %44 {offsets = [16, 0], sizes = [16, 128], strides = [1, 1]} : vector<32x128xf32> to vector<16x128xf32>
      %47 = tpu.concatenate %16, %26 in 0 : vector<16x128xf32>, vector<16x128xf32> -> vector<32x128xf32>
      %48 = arith.truncf %47 : vector<32x128xf32> to vector<32x128xbf16>
      %49 = arith.truncf %22 : vector<16x128xf32> to vector<16x128xbf16>
      %cst_19 = arith.constant dense<0.000000e+00> : vector<32x16xf32>
      %50 = tpu.matmul %48, %49, %cst_19 {dimension_numbers = #tpu.dot_dimension_numbers<[1], [1], [0], [0], [0, 0, 1, 0], [], []>} : vector<32x128xbf16>, vector<16x128xbf16>, vector<32x16xf32> -> vector<32x16xf32>
      %cst_20 = arith.constant dense<0xFF800000> : vector<32xf32>
      %51 = vector.multi_reduction <maximumf>, %50, %cst_20 [1] : vector<32x16xf32> to vector<32xf32>
      %52 = vector.shape_cast %51 : vector<32xf32> to vector<32x1xf32>
      %53 = vector.broadcast %52 : vector<32x1xf32> to vector<32x16xf32>
      %54 = arith.subf %50, %53 : vector<32x16xf32>
      %55 = math.exp %54 : vector<32x16xf32>
      %cst_21 = arith.constant dense<0.000000e+00> : vector<32xf32>
      %56 = vector.multi_reduction <add>, %55, %cst_21 [1] : vector<32x16xf32> to vector<32xf32>
      %57 = vector.shape_cast %56 : vector<32xf32> to vector<32x1xf32>
      %58 = vector.broadcast %57 : vector<32x1xf32> to vector<32x16xf32>
      %59 = arith.divf %55, %58 : vector<32x16xf32>
      %60 = arith.truncf %59 : vector<32x16xf32> to vector<32x16xbf16>
      %61 = arith.truncf %23 : vector<16x128xf32> to vector<16x128xbf16>
      %cst_22 = arith.constant dense<0.000000e+00> : vector<32x128xf32>
      %62 = tpu.matmul %60, %61, %cst_22 {dimension_numbers = #tpu.dot_dimension_numbers<[1], [0], [0], [1], [0, 0, 1, 1], [], []>} : vector<32x16xbf16>, vector<16x128xbf16>, vector<32x128xf32> -> vector<32x128xf32>
      %63 = vector.extract_strided_slice %62 {offsets = [0, 0], sizes = [16, 128], strides = [1, 1]} : vector<32x128xf32> to vector<16x128xf32>
      %64 = vector.extract_strided_slice %62 {offsets = [16, 0], sizes = [16, 128], strides = [1, 1]} : vector<32x128xf32> to vector<16x128xf32>
      %65 = tpu.concatenate %16, %21 in 0 : vector<16x128xf32>, vector<16x128xf32> -> vector<32x128xf32>
      %66 = arith.truncf %65 : vector<32x128xf32> to vector<32x128xbf16>
      %67 = arith.truncf %27 : vector<16x128xf32> to vector<16x128xbf16>
      %cst_23 = arith.constant dense<0.000000e+00> : vector<32x16xf32>
      %68 = tpu.matmul %66, %67, %cst_23 {dimension_numbers = #tpu.dot_dimension_numbers<[1], [1], [0], [0], [0, 0, 1, 0], [], []>} : vector<32x128xbf16>, vector<16x128xbf16>, vector<32x16xf32> -> vector<32x16xf32>
      %cst_24 = arith.constant dense<0xFF800000> : vector<32xf32>
      %69 = vector.multi_reduction <maximumf>, %68, %cst_24 [1] : vector<32x16xf32> to vector<32xf32>
      %70 = vector.shape_cast %69 : vector<32xf32> to vector<32x1xf32>
      %71 = vector.broadcast %70 : vector<32x1xf32> to vector<32x16xf32>
      %72 = arith.subf %68, %71 : vector<32x16xf32>
      %73 = math.exp %72 : vector<32x16xf32>
      %cst_25 = arith.constant dense<0.000000e+00> : vector<32xf32>
      %74 = vector.multi_reduction <add>, %73, %cst_25 [1] : vector<32x16xf32> to vector<32xf32>
      %75 = vector.shape_cast %74 : vector<32xf32> to vector<32x1xf32>
      %76 = vector.broadcast %75 : vector<32x1xf32> to vector<32x16xf32>
      %77 = arith.divf %73, %76 : vector<32x16xf32>
      %78 = arith.truncf %77 : vector<32x16xf32> to vector<32x16xbf16>
      %79 = arith.truncf %28 : vector<16x128xf32> to vector<16x128xbf16>
      %cst_26 = arith.constant dense<0.000000e+00> : vector<32x128xf32>
      %80 = tpu.matmul %78, %79, %cst_26 {dimension_numbers = #tpu.dot_dimension_numbers<[1], [0], [0], [1], [0, 0, 1, 1], [], []>} : vector<32x16xbf16>, vector<16x128xbf16>, vector<32x128xf32> -> vector<32x128xf32>
      %81 = vector.extract_strided_slice %80 {offsets = [0, 0], sizes = [16, 128], strides = [1, 1]} : vector<32x128xf32> to vector<16x128xf32>
      %82 = vector.extract_strided_slice %80 {offsets = [16, 0], sizes = [16, 128], strides = [1, 1]} : vector<32x128xf32> to vector<16x128xf32>
      %83 = arith.addf %63, %17 : vector<16x128xf32>
      %c0_27 = arith.constant 0 : index
      %c0_28 = arith.constant 0 : index
      %84 = vector.load %arg4[%c0_27, %c0_28] : memref<16x256xf32, #tpu.memory_space<vmem>>, vector<16x128xf32>
      tpu.vector_store %arg4[%c0_27, %c0_28], %83 {strides = array<i32>} : memref<16x256xf32, #tpu.memory_space<vmem>>, vector<16x128xf32>,
      %85 = arith.addf %81, %17 : vector<16x128xf32>
      %c0_29 = arith.constant 0 : index
      %c128 = arith.constant 128 : index
      %86 = vector.load %arg4[%c0_29, %c128] : memref<16x256xf32, #tpu.memory_space<vmem>>, vector<16x128xf32>
      tpu.vector_store %arg4[%c0_29, %c128], %85 {strides = array<i32>} : memref<16x256xf32, #tpu.memory_space<vmem>>, vector<16x128xf32>,
      %87 = arith.addf %45, %22 : vector<16x128xf32>
      %c0_30 = arith.constant 0 : index
      %c0_31 = arith.constant 0 : index
      %88 = vector.load %arg5[%c0_30, %c0_31] : memref<16x256xf32, #tpu.memory_space<vmem>>, vector<16x128xf32>
      tpu.vector_store %arg5[%c0_30, %c0_31], %87 {strides = array<i32>} : memref<16x256xf32, #tpu.memory_space<vmem>>, vector<16x128xf32>,
      %89 = arith.addf %82, %22 : vector<16x128xf32>
      %c0_32 = arith.constant 0 : index
      %c128_33 = arith.constant 128 : index
      %90 = vector.load %arg5[%c0_32, %c128_33] : memref<16x256xf32, #tpu.memory_space<vmem>>, vector<16x128xf32>
      tpu.vector_store %arg5[%c0_32, %c128_33], %89 {strides = array<i32>} : memref<16x256xf32, #tpu.memory_space<vmem>>, vector<16x128xf32>,
      %91 = arith.addf %46, %27 : vector<16x128xf32>
      %c0_34 = arith.constant 0 : index
      %c0_35 = arith.constant 0 : index
      %92 = vector.load %arg6[%c0_34, %c0_35] : memref<16x256xf32, #tpu.memory_space<vmem>>, vector<16x128xf32>
      tpu.vector_store %arg6[%c0_34, %c0_35], %91 {strides = array<i32>} : memref<16x256xf32, #tpu.memory_space<vmem>>, vector<16x128xf32>,
      %93 = arith.addf %64, %27 : vector<16x128xf32>
      %c0_36 = arith.constant 0 : index
      %c128_37 = arith.constant 128 : index
      %94 = vector.load %arg6[%c0_36, %c128_37] : memref<16x256xf32, #tpu.memory_space<vmem>>, vector<16x128xf32>
      tpu.vector_store %arg6[%c0_36, %c128_37], %93 {strides = array<i32>} : memref<16x256xf32, #tpu.memory_space<vmem>>, vector<16x128xf32>,
    } else {
    }
    return
  }
  func.func @transform_0(%arg0: i32) -> (i32, i32, i32) {
    %c0_i32 = arith.constant 0 : i32
    %c0_i32_0 = arith.constant 0 : i32
    %c0_i32_1 = arith.constant 0 : i32
    return %arg0, %c0_i32, %c0_i32_0 : i32, i32, i32
  }
  func.func @transform_1(%arg0: i32) -> (i32, i32) {
    %c0_i32 = arith.constant 0 : i32
    %c0_i32_0 = arith.constant 0 : i32
    return %c0_i32, %arg0 : i32, i32
  }
  func.func @transform_2(%arg0: i32) -> (i32, i32) {
    %c0_i32 = arith.constant 0 : i32
    %c0_i32_0 = arith.constant 0 : i32
    return %c0_i32, %arg0 : i32, i32
  }
  func.func @transform_3(%arg0: i32) -> (i32, i32) {
    %c0_i32 = arith.constant 0 : i32
    %c0_i32_0 = arith.constant 0 : i32
    %c0_i32_1 = arith.constant 0 : i32
    return %c0_i32, %c0_i32_0 : i32, i32
  }
  func.func @transform_4(%arg0: i32) -> (i32, i32) {
    %c0_i32 = arith.constant 0 : i32
    %c0_i32_0 = arith.constant 0 : i32
    %c0_i32_1 = arith.constant 0 : i32
    return %c0_i32, %c0_i32_0 : i32, i32
  }
  func.func @transform_5(%arg0: i32) -> (i32, i32) {
    %c0_i32 = arith.constant 0 : i32
    %c0_i32_0 = arith.constant 0 : i32
    %c0_i32_1 = arith.constant 0 : i32
    return %c0_i32, %c0_i32_0 : i32, i32
  }
}

</mosaic_0001>

<bundles_post_ra>
// kernel: tpu_custom_call.1
= control target key start
LH: loop header
LB: loop body
LE: loop exit
PB: predicated region body
PF: predicated region fallthrough
CT: control target
= control target key end

     0   :  { %s2096_s0 = inlined_call_operand.hbm [shape: bf16[3,16,96], index: 0, kind: input, shape index: {}]   ;;  %s2097_s1 = inlined_call_operand.hbm [shape: bf16[96,1152], index: 1, kind: input, shape index: {}]   ;;  %s2098_s2 = inlined_call_operand.hbm [shape: f32[1,1152], index: 2, kind: input, shape index: {}]   ;;  %s2099_s3 = inlined_call_operand.hbm [shape: f32[16,256], index: 3, kind: output, shape index: {0}]   ;;  %s2100_s4 = inlined_call_operand.hbm [shape: f32[16,256], index: 4, kind: output, shape index: {1}]   ;;  %s2101_s5 = inlined_call_operand.hbm [shape: f32[16,256], index: 5, kind: output, shape index: {2}]  }
   0x1   :  { %2105 = sst [smem:[#allocation19_spill]] %s2096_s0 }
   0x2   :  { %2106 = sst [smem:[#allocation20_spill]] %s2097_s1 }
   0x3   :  { %11 = vsyncpa [#allocation4], 0 }
   0x4   :  { %13 = vsyncpa [#allocation4 + $0x1], 0 }
   0x5   :  { %14 = vsyncpa [#allocation7], 0 }
   0x6   :  { %16 = vsyncpa [#allocation7 + $0x1], 0 }
   0x7   :  { %17 = vsyncpa [#allocation5], 0 }
   0x8   :  { %18 = vsyncpa [#allocation11], 0  ;;  %s1752_s18 = smov 0   ;;  %s1754_s19 = smov 0  }
   0x9   :  { %s1756_s20 = smov 0   ;;  %s1758_s21 = smov 0  }
   0xa LB: > { %2107 = sst [smem:[#allocation17_spill]] %s1700_s20  ;;  %s1771_s22 = sadd.s32 4294967295, %s1704_s21   ;;  %s1704_s21 = sphi %s1758_s21, %s2123_s21   ;;  %s1700_s20 = sphi %s1756_s20, %s2120_s20   ;;  %s1696_s19 = sphi %s1754_s19, %s2122_s19   ;;  %s1692_s18 = sphi %s1752_s18, %s2121_s18  }
   0xb   : > { %s1774_s23 = sadd.s32 1, %s1704_s21   ;;  %s31_s25 = sadd.s32 1, %s1700_s20 }
   0xc   : > { %s28_s24 = ssub.s32 %s1704_s21, %s1774_s23  ;;  %p38_p1 = scmp.ne.s32.totalorder %s1700_s20, %s1696_s19 }
   0xd   : > { %p29_p0 = scmp.eq.s32.totalorder %s28_s24, 0  ;;  %p39_p2 = scmp.eq.s32.totalorder %s1704_s21, 0 }
   0xe   : > { %p44_p3 = scmp.ne.s32.totalorder %s1696_s19, %s1692_s18  ;;  %p45_p5 = scmp.eq.s32.totalorder %s1771_s22, 0 }
   0xf   : > { %s1784_s26 = scalar_select %p29_p0, %s1700_s20, %s31_s25  }
  0x10   : > { %p40_p4 = por %p39_p2, %p38_p1  ;;  %p1365_p6 = scmp.lt.s32.totalorder %s1704_s21, 3 }
  0x11   : > { %2108 = sst [smem:[#allocation18_spill]] %s1784_s26  ;;  %p1788_p7 = por %p45_p5, %p44_p3 }
  0x12   : > { %s1793_s28 = sand.u32 1, %s1700_s20   ;;  %p1795_p8 = pnand %p1365_p6, %p40_p4 }
  0x13   : > { %s2109_s27 = scalar_select %p1788_p7, 1, 0 }
  0x14   : > { %s2110_s29 = scalar_select %p1795_p8, 1, 0 }
  0x15   : > { %s204_s30 = sand.u32 1, %s1704_s21   ;;  %s1333_s6 = smul.u32 144, %s1793_s28 }
  0x16   : > { %s1253_s7 = smul.u32 192, %s1704_s21  ;;  %s2111_s1 = sld [smem:[#allocation20_spill]] }
  0x17   : > { %s208_s11 = scalar_lea.vmem [#allocation6], %s1333_s6  ;;  %s1810_s13 = scalar_lea.sflag [#allocation7], %s204_s30 }
  0x18   : > { %s215_s12 = sshll.u32 %s208_s11, 4  ;;  %p1816_p11 = pneg %p1795_p8  ;;  %s1807_s12 = int_to_ptr.vmem [resolvable:$true] %s215_s12 }
  0x1c   : > { %s1805_s10 = scalar_lea.hbm %s2111_s1, %s1253_s7  ;;  %s1495_s18 = scalar_lea.hbm %s2111_s1, 6912 }
  0x1d   : > { %s1490_s14 = scalar_lea.hbm %s1805_s10, 2304  ;;  %p1496_p0 = scmp.lt.u32.totalorder %s1805_s10, %s2111_s1 }
  0x1e   : > { %p1491_p10 = scmp.ne.s32.totalorder %s1805_s10, %s1490_s14  ;;  %p1497_p1 = scmp.lt.u32.totalorder %s1495_s18, %s1490_s14 }
  0x1f   : > { %p1499_p3 = scmp.lt.u32.totalorder %s1490_s14, %s1805_s10 }
  0x20   : > { %p1493_p12 = pnand %p1816_p11, %p1491_p10  ;;  %p1498_p2 = por %p1497_p1, %p1496_p0 }
  0x22   : > { %p1494_p13 = pneg %p1493_p12  ;;  %p1500_p4 = por %p1499_p3, %p1498_p2 }
  0x24   : > { %p1501_p5 = pnand %p1500_p4, %p1494_p13 }
  0x26   : > { %1504 = shalt.err (!%p1501_p5)
}
  0x27   : > { %s1505_s30 = scalar_lea.vmem %s1807_s12, 2304  ;;  %s1706_s6 = smov [#allocation6]  }
  0x28   : > { %p1506_p6 = scmp.ne.s32.totalorder %s1807_s12, %s1505_s30  ;;  %s1510_s7 = sshll.u32 %s1706_s6, 4  ;;  %s1511_s7 = int_to_ptr.vmem [resolvable:$false] %s1510_s7 }
  0x29   : > { %s1512_s8 = scalar_lea.vmem %s1511_s7, 4608  ;;  %p1513_p9 = scmp.lt.s32.totalorder %s1807_s12, %s1511_s7 }
  0x2a   : > { %p1508_p10 = pnand %p1506_p6, %p1816_p11  ;;  %p1514_p7 = scmp.lt.s32.totalorder %s1512_s8, %s1505_s30 }
  0x2c   : > { %p1509_p12 = pneg %p1508_p10  ;;  %p1515_p0 = por %p1514_p7, %p1513_p9 }
  0x2e   : > { %p1516_p1 = pnand %p1515_p0, %p1509_p12 }
  0x30   : > { %1519 = shalt.err (!%p1516_p1)
}
  0x31   : > { %s1707_s9 = smov 576   ;;  %s1708_s11 = smov 192  }
  0x32   : > { %s1709_s14 = smov 12   ;;  %p242_p13 = scmp.lt.s32.totalorder %s1704_s21, 4 }
  0x33   : > { %1361 = dma.hbm_to_vmem [thread:$0]  (!%p1795_p8), %s1805_s10, 2304, %s1807_s12, %s1810_s13, %s1707_s9, %s1708_s11, %s1709_s14  }
  0x34   : > { %s1208_s16 = sshll.u32 %s1793_s28, 3  ;;  %s1252_s17 = sshll.u32 %s1704_s21, 7 }
  0x35   : > { %p2113_p7 = scmp.ge.s32.totalorder %s1704_s21, 1  ;;  %s2115_s0 = sld [smem:[#allocation19_spill]] }
  0x36   : > { %s187_s6 = scalar_lea.vmem [#allocation3], %s1208_s16  ;;  %s1334_s10 = smul.u32 3, %s1793_s28 }
  0x37   : > { %p1845_p9 = pnand %p2113_p7, %p242_p13  ;;  %s194_s7 = sshll.u32 %s187_s6, 4  ;;  %s1854_s7 = int_to_ptr.vmem [resolvable:$true] %s194_s7 }
  0x38   : > { %s184_s12 = scalar_lea.sflag [#allocation4], %s1793_s28 }
  0x39   : > { %s2114_s18 = scalar_select %p1845_p9, 1, 0 }
  0x3b   : > { %s1852_s30 = scalar_lea.hbm %s2115_s0, %s1252_s17  ;;  %s1525_s14 = scalar_lea.hbm %s2115_s0, 384 }
  0x3c   : > { %s1520_s8 = scalar_lea.hbm %s1852_s30, 128  ;;  %p1526_p5 = scmp.lt.u32.totalorder %s1852_s30, %s2115_s0 }
  0x3d   : > { %p1521_p2 = scmp.ne.s32.totalorder %s1852_s30, %s1520_s8  ;;  %p1527_p6 = scmp.lt.u32.totalorder %s1525_s14, %s1520_s8 }
  0x3e   : > { %p1529_p12 = scmp.lt.u32.totalorder %s1520_s8, %s1852_s30 }
  0x3f   : > { %p1523_p3 = pnand %p1521_p2, %p1816_p11  ;;  %p1528_p10 = por %p1527_p6, %p1526_p5 }
  0x41   : > { %p1524_p4 = pneg %p1523_p3  ;;  %p1530_p0 = por %p1529_p12, %p1528_p10 }
  0x43   : > { %p1531_p1 = pnand %p1530_p0, %p1524_p4 }
  0x45   : > { %1534 = shalt.err (!%p1531_p1)
}
  0x46   : > { %s1535_s16 = scalar_lea.vmem %s1854_s7, 128  ;;  %s1710_s25 = smov [#allocation3]  }
  0x47   : > { %p1536_p13 = scmp.ne.s32.totalorder %s1854_s7, %s1535_s16  ;;  %s1540_s6 = sshll.u32 %s1710_s25, 4  ;;  %s1541_s6 = int_to_ptr.vmem [resolvable:$false] %s1540_s6 }
  0x48   : > { %s1542_s9 = scalar_lea.vmem %s1541_s6, 256  ;;  %p1543_p3 = scmp.lt.s32.totalorder %s1854_s7, %s1541_s6 }
  0x49   : > { %p1538_p7 = pnand %p1536_p13, %p1816_p11  ;;  %p1544_p9 = scmp.lt.s32.totalorder %s1542_s9, %s1535_s16 }
  0x4b   : > { %p1539_p2 = pneg %p1538_p7  ;;  %p1545_p5 = por %p1544_p9, %p1543_p3 }
  0x4d   : > { %p1546_p6 = pnand %p1545_p5, %p1539_p2 }
  0x4f   : > { %1549 = shalt.err (!%p1546_p6)
}
  0x50   : > { %s1711_s8 = smov 64   ;;  %s1712_s11 = smov 4  }
  0x51   : > { %1358 = dma.hbm_to_vmem [thread:$0]  (!%p1795_p8), %s1852_s30, 128, %s1854_s7, %s184_s12, %s1711_s8, %s1711_s8, %s1712_s11  }
  0x52   : > { %s1254_s14 = smul.u32 48, %s1704_s21  ;;  %s229_s17 = scalar_lea.vmem [#allocation8], %s1334_s10 }
  0x53   : > { %s237_s24 = sshll.u32 %s229_s17, 4  ;;  %s1555_s26 = scalar_lea.hbm %s2098_s2, 144  ;;  %s238_s24 = int_to_ptr.vmem [resolvable:$true] %s237_s24 }
  0x54   : > { %s235_s6 = scalar_lea.hbm %s2098_s2, %s1254_s14 }
  0x55   : > { %s1550_s9 = scalar_lea.hbm %s235_s6, 48  ;;  %p1556_p12 = scmp.lt.u32.totalorder %s235_s6, %s2098_s2 }
  0x56   : > { %p1551_p9 = scmp.ne.s32.totalorder %s235_s6, %s1550_s9  ;;  %p1557_p0 = scmp.lt.u32.totalorder %s1555_s26, %s1550_s9 }
  0x57   : > { %p1559_p13 = scmp.lt.u32.totalorder %s1550_s9, %s235_s6 }
  0x58   : > { %p1553_p4 = pnand %p1551_p9, %p1816_p11  ;;  %p1558_p1 = por %p1557_p0, %p1556_p12 }
  0x5a   : > { %p1554_p10 = pneg %p1553_p4  ;;  %p1560_p7 = por %p1559_p13, %p1558_p1 }
  0x5c   : > { %p1561_p2 = pnand %p1560_p7, %p1554_p10 }
  0x5e   : > { %1564 = shalt.err (!%p1561_p2)
}
  0x5f   : > { %s1565_s21 = scalar_lea.vmem %s238_s24, 48  ;;  %s1713_s28 = smov [#allocation8]  }
  0x60   : > { %p1566_p3 = scmp.ne.s32.totalorder %s238_s24, %s1565_s21  ;;  %s1570_s7 = sshll.u32 %s1713_s28, 4  ;;  %s1571_s7 = int_to_ptr.vmem [resolvable:$false] %s1570_s7 }
  0x61   : > { %s1572_s0 = scalar_lea.vmem %s1571_s7, 96  ;;  %p1573_p9 = scmp.lt.s32.totalorder %s238_s24, %s1571_s7 }
  0x62   : > { %p1568_p5 = pnand %p1566_p3, %p1816_p11  ;;  %p1574_p4 = scmp.lt.s32.totalorder %s1572_s0, %s1565_s21 }
  0x64   : > { %p1569_p6 = pneg %p1568_p5  ;;  %p1575_p8 = por %p1574_p4, %p1573_p9 }
  0x66   : > { %p1576_p0 = pnand %p1575_p8, %p1569_p6 }
  0x68   : > { %1579 = shalt.err (!%p1576_p0)
}
  0x69   : > { %p2116_p12 = scmp.ne.s32.totalorder %s2110_s29, 0  ;;  %p2117_p10 = scmp.ne.s32.totalorder %s2114_s18, 0 }
  0x6a   : > { %s1903_s1 = sand.u32 (!%p2117_p10), 1, %s1696_s19   ;;  %p2118_p11 = scmp.ne.s32.totalorder (!%p2117_p10), %s2109_s27, 0 }
  0x6b   : > { %1364 = dma.hbm_to_vmem [thread:$0]  (!%p2116_p12), %s235_s6, 48, %s238_s24, %s1810_s13  }
  0x6c   : > { %246 = sbr.rel (%p2117_p10) target bundleno = 1759 (0x6df), region = 32  ;;  %s1214_s20 = sshll.u32 (!%p2117_p10), %s1903_s1, 3 }
  0x6d   : > { %s249_s26 = scalar_lea.sflag (!%p2117_p10), [#allocation4], %s1903_s1  ;;  %s1907_s15 = scalar_lea.vmem (!%p2117_p10), [#allocation3], %s1214_s20 }
  0x73   : > { %1675 = dma.done.wait (%p2118_p11), %s249_s26, 128  }
  0x74   : > { %1677 = vsyncadd (%p2118_p11), %s249_s26, 4294967168  ;;  %s257_s29 = sand.u32 1, %s1771_s22   ;;  %s1335_s13 = smul.u32 144, %s1903_s1 }
  0x75   : > { %s258_s18 = scalar_lea.sflag [#allocation7], %s257_s29 }
  0x76   : > { %s1915_s10 = scalar_lea.vmem [#allocation6], %s1335_s13 }
  0x77   : > { %1679 = dma.done.wait (%p2118_p11), %s258_s18, 2352  }
  0x78   : > { %1681 = vsyncadd (%p2118_p11), %s258_s18, 4294964944  ;;  %v1714_v0 = vmov 0.0   ;;  %vm1715_vm0 = vmmov 0   ;;  %v1716_v1 = vmov 0   ;;  %v1417_v2 = vld [vmem:[%s1915_s10 + $0x4] ss:$12 sps:$4 sm:$0xff]   ;;  %v333_v21 = vlaneseq }
  0x79   : > { %1281 = vmatprep.subr.bf16.mxu1 %v1714_v0  ;;  %1293 = vmatprep.mubr.msk.bf16.mxu1 %vm1715_vm0, %v1714_v0  ;;  %v1419_v3 = vld [vmem:[%s1915_s10 + $0x8] ss:$12 sps:$4 sm:$0xff]   ;;  %v1420_v4 = vld [vmem:[%s1915_s10] ss:$12 sps:$4 sm:$0xff]   ;;  %v1424_v7 = vld [vmem:[%s1915_s10 + $0x18] ss:$12 sps:$4 sm:$0xff]  }
  0x7a   : > { %485 = vmatprep.mubr.bf16.mxu0 %v1716_v1  ;;  %453 = vmatprep.subr.bf16.mxu0 %v1417_v2  ;;  %v1421_v5 = vld [vmem:[%s1915_s10 + $0x1c] ss:$12 sps:$4 sm:$0xff]   ;;  %v1423_v6 = vld [vmem:[%s1915_s10 + $0x20] ss:$12 sps:$4 sm:$0xff]   ;;  %v1427_v9 = vld [vmem:[%s1915_s10 + $0x38] ss:$12 sps:$4 sm:$0xff]  }
  0x7b   : > { %1282 = vmatpush3.bf16.msra.mxu1 %v1419_v3  ;;  %454 = vmatpush1.bf16.msra.mxu0 %v1420_v4  ;;  %v1425_v8 = vld [vmem:[%s1915_s10 + $0x34] ss:$12 sps:$4 sm:$0xff]   ;;  %v1428_v10 = vld [vmem:[%s1915_s10 + $0x30] ss:$12 sps:$4 sm:$0xff]   ;;  %v1429_v11 = vld [vmem:[%s1915_s10 + $0x4c] ss:$12 sps:$4 sm:$0xff]  }
  0x7c   : > { %1283 = vmatprep.subr.bf16.mxu1 %v1714_v0  ;;  %455 = vmatprep.subr.bf16.mxu0 %v1421_v5  ;;  %v1431_v12 = vld [vmem:[%s1915_s10 + $0x50] ss:$12 sps:$4 sm:$0xff]   ;;  %v1432_v13 = vld [vmem:[%s1915_s10 + $0x48] ss:$12 sps:$4 sm:$0xff]   ;;  %v1436_v16 = vld [vmem:[%s1915_s10 + $0x60] ss:$12 sps:$4 sm:$0xff]  }
  0x7d   : > { %v1433_v14 = vld [vmem:[%s1915_s10 + $0x64] ss:$12 sps:$4 sm:$0xff]   ;;  %v1435_v15 = vld [vmem:[%s1915_s10 + $0x68] ss:$12 sps:$4 sm:$0xff]   ;;  %v1439_v18 = vld [vmem:[%s1915_s10 + $0x80] ss:$12 sps:$4 sm:$0xff]  }
  0x7e   : > { %v1437_v17 = vld [vmem:[%s1915_s10 + $0x7c] ss:$12 sps:$4 sm:$0xff]   ;;  %v1440_v19 = vld [vmem:[%s1915_s10 + $0x78] ss:$12 sps:$4 sm:$0xff]   ;;  %vm449_vm1 = vcmask 785408   ;;  %s1336_s27 = smul.u32 3, %s1903_s1 }
  0x7f   : > { %1284 = vmatpush3.bf16.msra.mxu1 %v1423_v6  ;;  %456 = vmatpush1.bf16.msra.mxu0 %v1424_v7  ;;  %v1441_v20 = vld [vmem:[%s1907_s15] sm:$0xff]   ;;  %v334_v22 = vshrl.u32 %v333_v21, 7  ;;  %s1255_s8 = smul.u32 48, %s1771_s22  ;;  %p1237_p8 = scmp.ne.s32.totalorder %s1771_s22, 2 }
  0x80   : > { %1285 = vmatprep.subr.bf16.mxu1 %v1714_v0  ;;  %457 = vmatprep.subr.bf16.mxu0 %v1425_v8  ;;  %s270_s12 = scalar_lea.vmem [#allocation8], %s1336_s27  ;;  %vm622_vm2 = vcmask (!%p1237_p8), 130048  }
  0x81   : > { %v343_v23 = vsub.s32 2, %v334_v22  ;;  %v331_v24 = vld [vmem:[%s270_s12] sm:$0x7]  ;;  %v335_v25 = vsub.s32 0, %v334_v22  ;;  %v339_v26 = vsub.s32 1, %v334_v22  ;;  %s539_s11 = scalar_lea.vmem [#allocation2], %s1255_s8 }
  0x83   : > { %1286 = vmatpush3.bf16.msra.mxu1 %v1427_v9  ;;  %458 = vmatpush1.bf16.msra.mxu0 %v1428_v10  ;;  %v344_v27 = vrot.slane %v331_v24, %v343_v23  ;;  %v336_v28 = vrot.slane %v331_v24, %v335_v25  ;;  %v340_v29 = vrot.slane %v331_v24, %v339_v26 }
  0x84   : > { %1287 = vmatprep.subr.bf16.mxu1 %v1714_v0  ;;  %459 = vmatprep.subr.bf16.mxu0 %v1429_v11 }
  0x87   : > { %1288 = vmatpush3.bf16.msra.mxu1 %v1431_v12  ;;  %460 = vmatpush1.bf16.msra.mxu0 %v1432_v13 }
  0x88   : > { %1289 = vmatprep.subr.bf16.mxu1 %v1714_v0  ;;  %461 = vmatprep.subr.bf16.mxu0 %v1433_v14 }
  0x8b   : > { %1290 = vmatpush3.bf16.msra.mxu1 %v1435_v15  ;;  %462 = vmatpush1.bf16.msra.mxu0 %v1436_v16 }
  0x8c   : > { %1291 = vmatprep.subr.bf16.mxu1 %v1714_v0  ;;  %463 = vmatprep.subr.bf16.mxu0 %v1437_v17 }
  0x8f   : > { %1292 = vmatpush3.bf16.msra.mxu1 %v1439_v18  ;;  %464 = vmatpush1.bf16.msra.mxu0 %v1440_v19 }
  0x92   : > { %1294 = vmatmul.mubr.msk.bf16.vlgmr.msra.gmra.mrb[0].mxu1 %vm449_vm1, %v1441_v20  ;;  %1234 = vmatmul.mubr.msk.bf16.vlgmr.msra.gmra.mrb[0].mxu0 %vm449_vm1, %v1441_v20 }
 0x165   : > { %v530_v30 = vpop.f32.mrb[0].mxu1  ;;  %v487_v32 = vpop.f32.mrb[0].mxu0  ;;  %549 = sbr.rel (%p1237_p8) target bundleno = 1687 (0x697), region = 48 }
 0x166   : > { %v531_v31 = vadd.f32 %v530_v30, %v344_v27  ;;  %v1295_v33 = vpop.f32.mrb[1].mxu1  ;;  %v488_v34 = vadd.f32 %v487_v32, %v336_v28  ;;  %v489_v35 = vpop.f32.mrb[1].mxu0 }
 0x167   : > { %v533_v36 = vpop.f32.mrb[2].mxu1  ;;  %v490_v37 = vadd.f32 %v489_v35, %v340_v29  ;;  %v491_v39 = vpop.f32.mrb[2].mxu0 }
 0x168   : > { %542 = vst [vmem:[%s539_s11 + $0x10] sm:$0xff] %v531_v31  ;;  %v534_v38 = vadd.f32 %v533_v36, %v344_v27  ;;  %v1296_v40 = vpop.f32.mrb[3].mxu1  ;;  %540 = vst [vmem:[%s539_s11] sm:$0xff] %v488_v34  ;;  %v492_v41 = vadd.f32 %v491_v39, %v336_v28  ;;  %v493_v42 = vpop.f32.mrb[3].mxu0 }
 0x169   : > { %541 = vst [vmem:[%s539_s11 + $0x8] sm:$0xff] %v490_v37  ;;  %v494_v43 = vadd.f32 %v493_v42, %v340_v29 }
 0x16a   : > { %545 = vst [vmem:[%s539_s11 + $0x28] sm:$0xff] %v534_v38  ;;  %543 = vst [vmem:[%s539_s11 + $0x18] sm:$0xff] %v492_v41 }
 0x16b   : > { %544 = vst [vmem:[%s539_s11 + $0x20] sm:$0xff] %v494_v43 }
 0x172   : > { %v1943_v44 = vld [vmem:[#allocation2 + $0x8] sm:$0xff]  ;;  %v1945_v45 = vld [vmem:[#allocation2 + $0x20] sm:$0xff]  ;;  %v557_v46 = vld [vmem:[#allocation2 + $0x30] sm:$0xff] }
 0x173   : > { %v572_v47 = vpack.c.bf16 %v1945_v45, %v1943_v44  ;;  %v560_v48 = vld [vmem:[#allocation2 + $0x48] sm:$0xff]  ;;  %v564_v50 = vld [vmem:[#allocation2 + $0x60] sm:$0xff]  ;;  %v567_v51 = vld [vmem:[#allocation2 + $0x78] sm:$0xff] }
 0x174   : > { %v1949_v49 = vpack.c.bf16 %v560_v48, %v557_v46  ;;  %v1952_v52 = vpack.c.bf16 %v567_v51, %v564_v50  ;;  %v552_v17 = vld [vmem:[#allocation2 + $0x10] sm:$0xff]  ;;  %v555_v18 = vld [vmem:[#allocation2 + $0x28] sm:$0xff]  ;;  %v1963_v20 = vld [vmem:[#allocation2 + $0x38] sm:$0xff] }
 0x175   : > { %1297 = vmatprep.subr.bf16.mxu0 %v572_v47  ;;  %v669_v19 = vpack.c.bf16 %v555_v18, %v552_v17  ;;  %v1965_v21 = vld [vmem:[#allocation2 + $0x50] sm:$0xff]  ;;  %v550_v33 = vld [vmem:[#allocation2] sm:$0xff]  ;;  %v553_v34 = vld [vmem:[#allocation2 + $0x18] sm:$0xff] }
 0x176   : > { %1298 = vmatpush3.bf16.xpose.msra.mxu0 %v572_v47  ;;  %1299 = vmatprep.mubr.bf16.mxu0 %v1949_v49  ;;  %v726_v22 = vpack.c.bf16 %v1965_v21, %v1963_v20  ;;  %v1969_v36 = vld [vmem:[#allocation2 + $0x68] sm:$0xff]  ;;  %v1971_v37 = vld [vmem:[#allocation2 + $0x80] sm:$0xff]  ;;  %v725_v40 = vpack.c.bf16 %v553_v34, %v550_v33 }
 0x177   : > { %1303 = vmatprep.subr.bf16.mxu1 %v669_v19  ;;  %v878_v42 = vpack.c.bf16 %v1971_v37, %v1969_v36 }
 0x178   : > { %1304 = vmatpush3.bf16.msra.mxu1 %v669_v19 }
 0x179   : > { %1309 = vmatprep.subr.bf16.mxu1 %v726_v22 }
 0x17d   : > { %1300 = vmatmul.mubr.bf16.vlgmr.msra.gmra.mrb[0].mxu0 %v1952_v52 }
 0x250   : > { %v1301_v53 = vpop.f32.mrb[0].mxu0 }
 0x251   : > { %v607_v54 = vpop.f32.mrb[1].mxu0  ;;  %v629_v55 = vsel %vm622_vm2, %v1301_v53, -inf }
 0x252   : > { %630 = vmax.xlane.f32.xlu1 %v629_v55  ;;  %v1302_v56 = vpop.f32.mrb[2].mxu0  ;;  %v623_v57 = vsel %vm622_vm2, %v607_v54, -inf }
 0x253   : > { %624 = vmax.xlane.f32.xlu0 %v623_v57  ;;  %v610_v58 = vpop.f32.mrb[3].mxu0  ;;  %v632_v59 = vsel %vm622_vm2, %v1302_v56, -inf }
 0x254   : > { %v626_v60 = vsel %vm622_vm2, %v610_v58, -inf }
 0x256   : > { %633 = vmax.xlane.f32.xlu1 %v632_v59 }
 0x257   : > { %627 = vmax.xlane.f32.xlu0 %v626_v60 }
 0x2df   : > { %v631_v61 = vpop.xlane.xlu1 %630 }
 0x2e0   : > { %v637_v62 = vsub.f32 %v1301_v53, %v631_v61  ;;  %v625_v63 = vpop.xlane.xlu0 %624 }
 0x2e1   : > { %v635_v0 = vsub.f32 %v607_v54, %v625_v63 }
 0x2e2   : > { %v643_v1 = vmul.f32 1.442695, %v637_v62 }
 0x2e3   : > { %v639_v2 = vmul.f32 1.442695, %v635_v0  ;;  %v634_v3 = vpop.xlane.xlu1 %633 }
 0x2e4   : > { %v638_v4 = vsub.f32 %v1302_v56, %v634_v3  ;;  %v628_v5 = vpop.xlane.xlu0 %627 }
 0x2e5   : > { %1442 = vpow2.f32 %v639_v2  ;;  %v636_v6 = vsub.f32 %v610_v58, %v628_v5 }
 0x2e6   : > { %1444 = vpow2.f32 %v643_v1  ;;  %v645_v7 = vmul.f32 1.442695, %v638_v4 }
 0x2e7   : > { %v641_v8 = vmul.f32 1.442695, %v636_v6 }
 0x2e9   : > { %1446 = vpow2.f32 %v641_v8 }
 0x2ea   : > { %1448 = vpow2.f32 %v645_v7 }
 0x2ef   : > { %v1443_v9 = vpop.eup %1442 }
 0x2f0   : > { %v647_v10 = vsel %vm622_vm2, %v1443_v9, 0.0  ;;  %v1445_v11 = vpop.eup %1444 }
 0x2f1   : > { %648 = vadd.xlane.f32.xlu0 %v647_v10  ;;  %v653_v13 = vsel %vm622_vm2, %v1445_v11, 0.0 }
 0x2f3   : > { %v1447_v12 = vpop.eup %1446 }
 0x2f4   : > { %v650_v14 = vsel %vm622_vm2, %v1447_v12, 0.0  ;;  %v1449_v15 = vpop.eup %1448 }
 0x2f5   : > { %654 = vadd.xlane.f32.xlu0 %v653_v13  ;;  %651 = vadd.xlane.f32.xlu1 %v650_v14  ;;  %v656_v16 = vsel %vm622_vm2, %v1449_v15, 0.0 }
 0x2f9   : > { %657 = vadd.xlane.f32.xlu1 %v656_v16 }
 0x37e   : > { %v649_v23 = vpop.xlane.xlu0 %648 }
 0x37f   : > { %1450 = vrcp.f32 %v649_v23 }
 0x382   : > { %v652_v24 = vpop.xlane.xlu1 %651  ;;  %v655_v25 = vpop.xlane.xlu0 %654 }
 0x383   : > { %1452 = vrcp.f32 %v652_v24 }
 0x384   : > { %1454 = vrcp.f32 %v655_v25 }
 0x386   : > { %v658_v26 = vpop.xlane.xlu1 %657 }
 0x387   : > { %1456 = vrcp.f32 %v658_v26 }
 0x389   : > { %v1451_v27 = vpop.eup %1450 }
 0x38a   : > { %v660_v29 = vmul.f32 %v1451_v27, %v1443_v9 }
 0x38d   : > { %v1453_v28 = vpop.eup %1452 }
 0x38e   : > { %v662_v30 = vmul.f32 %v1453_v28, %v1447_v12  ;;  %v1455_v31 = vpop.eup %1454 }
 0x38f   : > { %v664_v38 = vmul.f32 %v1455_v31, %v1445_v11 }
 0x390   : > { %v667_v32 = vpack.c.bf16 %v662_v30, %v660_v29 }
 0x391   : > { %v1457_v35 = vpop.eup %1456 }
 0x392   : > { %1305 = vmatprep.mubr.msk.bf16.mxu1 %vm622_vm2, %v667_v32  ;;  %v666_v39 = vmul.f32 %v1457_v35, %v1449_v15 }
 0x394   : > { %v668_v41 = vpack.c.bf16 %v666_v39, %v664_v38 }
 0x396   : > { %1306 = vmatmul.mubr.msk.bf16.vlgmr.msra.gmra.mrb[0].mxu1 %vm622_vm2, %v668_v41 }
 0x397   : > { %1310 = vmatpush3.bf16.xpose.msra.mxu1 %v726_v22  ;;  %1311 = vmatprep.mubr.bf16.mxu1 %v725_v40 }
 0x398   : > { %1321 = vmatprep.subr.bf16.mxu1 %v878_v42 }
 0x39e   : > { %1312 = vmatmul.mubr.bf16.vlgmr.msra.gmra.mrb[4].mxu1 %v1952_v52 }
 0x39f   : > { %1322 = vmatpush3.bf16.xpose.msra.mxu1 %v878_v42  ;;  %1323 = vmatprep.mubr.bf16.mxu1 %v725_v40 }
 0x3a6   : > { %1324 = vmatmul.mubr.bf16.vlgmr.msra.gmra.mrb[8].mxu1 %v1949_v49 }
 0x469   : > { %v1307_v43 = vpop.f32.mrb[0].mxu1 }
 0x46a   : > { %v1046_v46 = vadd.f32 %v1307_v43, %v1969_v36  ;;  %v710_v47 = vpop.f32.mrb[1].mxu1 }
 0x46b   : > { %v1038_v48 = vadd.f32 %v710_v47, %v1963_v20  ;;  %v1308_v50 = vpop.f32.mrb[2].mxu1 }
 0x46c   : > { %1048 = vst [vmem:[#allocation12] sm:$0xff] %v1046_v46  ;;  %v1047_v51 = vadd.f32 %v1308_v50, %v1971_v37  ;;  %v713_v53 = vpop.f32.mrb[3].mxu1 }
 0x46d   : > { %1040 = vst [vmem:[#allocation10] sm:$0xff] %v1038_v48  ;;  %v1039_v54 = vadd.f32 %v713_v53, %v1965_v21  ;;  %v559_v53 = vld [vmem:[#allocation2 + $0x40] sm:$0xff] }
 0x46e   : > { %1049 = vst [vmem:[#allocation12 + $0x10] sm:$0xff] %v1047_v51 }
 0x46f   : > { %1041 = vst [vmem:[#allocation10 + $0x10] sm:$0xff] %v1039_v54  ;;  %v562_v54 = vld [vmem:[#allocation2 + $0x58] sm:$0xff] }
 0x471   : > { %v1313_v52 = vpop.f32.mrb[4].mxu1 }
 0x472   : > { %v761_v55 = vpop.f32.mrb[5].mxu1  ;;  %v782_v59 = vsel %vm622_vm2, %v1313_v52, -inf }
 0x473   : > { %v1314_v56 = vpop.f32.mrb[6].mxu1  ;;  %v776_v49 = vsel %vm622_vm2, %v761_v55, -inf }
 0x474   : > { %777 = vmax.xlane.f32.xlu0 %v776_v49  ;;  %v764_v57 = vpop.f32.mrb[7].mxu1  ;;  %v785_v61 = vsel %vm622_vm2, %v1314_v56, -inf }
 0x475   : > { %v779_v58 = vsel %vm622_vm2, %v764_v57, -inf }
 0x476   : > { %780 = vmax.xlane.f32.xlu1 %v779_v58 }
 0x478   : > { %783 = vmax.xlane.f32.xlu0 %v782_v59 }
 0x479   : > { %v1325_v60 = vpop.f32.mrb[8].mxu1 }
 0x47a   : > { %v913_v62 = vpop.f32.mrb[9].mxu1  ;;  %786 = vmax.xlane.f32.xlu1 %v785_v61  ;;  %v934_v3 = vsel %vm622_vm2, %v1325_v60, -inf }
 0x47b   : > { %v1326_v63 = vpop.f32.mrb[10].mxu1  ;;  %v928_v0 = vsel %vm622_vm2, %v913_v62, -inf }
 0x47c   : > { %929 = vmax.xlane.f32.xlu0 %v928_v0  ;;  %v916_v1 = vpop.f32.mrb[11].mxu1  ;;  %v937_v4 = vsel %vm622_vm2, %v1326_v63, -inf }
 0x47d   : > { %v931_v2 = vsel %vm622_vm2, %v916_v1, -inf }
 0x47e   : > { %932 = vmax.xlane.f32.xlu1 %v931_v2 }
 0x480   : > { %935 = vmax.xlane.f32.xlu0 %v934_v3 }
 0x482   : > { %938 = vmax.xlane.f32.xlu1 %v937_v4 }
 0x501   : > { %v778_v5 = vpop.xlane.xlu0 %777 }
 0x502   : > { %v788_v6 = vsub.f32 %v761_v55, %v778_v5  ;;  %v566_v55 = vld [vmem:[#allocation2 + $0x70] sm:$0xff] }
 0x503   : > { %v781_v7 = vpop.xlane.xlu1 %780 }
 0x504   : > { %v792_v8 = vmul.f32 1.442695, %v788_v6  ;;  %v789_v9 = vsub.f32 %v764_v57, %v781_v7 }
 0x505   : > { %v784_v10 = vpop.xlane.xlu0 %783 }
 0x506   : > { %1458 = vpow2.f32 %v792_v8  ;;  %v794_v11 = vmul.f32 1.442695, %v789_v9  ;;  %v790_v12 = vsub.f32 %v1313_v52, %v784_v10  ;;  %v822_v52 = vpack.c.bf16 %v562_v54, %v559_v53 }
 0x507   : > { %v787_v13 = vpop.xlane.xlu1 %786 }
 0x508   : > { %1460 = vpow2.f32 %v794_v11  ;;  %v796_v14 = vmul.f32 1.442695, %v790_v12  ;;  %v791_v15 = vsub.f32 %v1314_v56, %v787_v13  ;;  %1315 = vmatprep.subr.bf16.mxu0 %v822_v52  ;;  %v569_v56 = vld [vmem:[#allocation2 + $0x88] sm:$0xff] }
 0x509   : > { %v930_v16 = vpop.xlane.xlu0 %929  ;;  %1316 = vmatpush3.bf16.msra.mxu0 %v822_v52  ;;  %v974_v49 = vpack.c.bf16 %v569_v56, %v566_v55 }
 0x50a   : > { %1462 = vpow2.f32 %v796_v14  ;;  %v798_v17 = vmul.f32 1.442695, %v791_v15  ;;  %v940_v18 = vsub.f32 %v913_v62, %v930_v16 }
 0x50b   : > { %v933_v19 = vpop.xlane.xlu1 %932  ;;  %1327 = vmatprep.subr.bf16.mxu0 %v974_v49 }
 0x50c   : > { %1464 = vpow2.f32 %v798_v17  ;;  %v944_v22 = vmul.f32 1.442695, %v940_v18  ;;  %v941_v23 = vsub.f32 %v916_v1, %v933_v19 }
 0x50d   : > { %v936_v24 = vpop.xlane.xlu0 %935 }
 0x50e   : > { %1466 = vpow2.f32 %v944_v22  ;;  %v946_v25 = vmul.f32 1.442695, %v941_v23  ;;  %v942_v26 = vsub.f32 %v1325_v60, %v936_v24 }
 0x50f   : > { %v939_v27 = vpop.xlane.xlu1 %938 }
 0x510   : > { %v1459_v28 = vpop.eup %1458  ;;  %1468 = vpow2.f32 %v946_v25  ;;  %v948_v29 = vmul.f32 1.442695, %v942_v26  ;;  %v943_v30 = vsub.f32 %v1326_v63, %v939_v27 }
 0x511   : > { %v800_v31 = vsel %vm622_vm2, %v1459_v28, 0.0 }
 0x512   : > { %v1461_v32 = vpop.eup %1460  ;;  %1470 = vpow2.f32 %v948_v29  ;;  %v950_v33 = vmul.f32 1.442695, %v943_v30  ;;  %801 = vadd.xlane.f32.xlu0 %v800_v31 }
 0x513   : > { %v803_v34 = vsel %vm622_vm2, %v1461_v32, 0.0 }
 0x514   : > { %v1463_v35 = vpop.eup %1462  ;;  %1472 = vpow2.f32 %v950_v33  ;;  %804 = vadd.xlane.f32.xlu1 %v803_v34 }
 0x515   : > { %v806_v38 = vsel %vm622_vm2, %v1463_v35, 0.0 }
 0x516   : > { %v1465_v39 = vpop.eup %1464  ;;  %807 = vadd.xlane.f32.xlu0 %v806_v38 }
 0x517   : > { %v809_v40 = vsel %vm622_vm2, %v1465_v39, 0.0 }
 0x518   : > { %v1467_v41 = vpop.eup %1466  ;;  %810 = vadd.xlane.f32.xlu1 %v809_v40 }
 0x519   : > { %v952_v42 = vsel %vm622_vm2, %v1467_v41, 0.0 }
 0x51a   : > { %v1469_v43 = vpop.eup %1468  ;;  %953 = vadd.xlane.f32.xlu0 %v952_v42 }
 0x51b   : > { %v955_v46 = vsel %vm622_vm2, %v1469_v43, 0.0 }
 0x51c   : > { %v1471_v47 = vpop.eup %1470  ;;  %956 = vadd.xlane.f32.xlu1 %v955_v46 }
 0x51d   : > { %v958_v48 = vsel %vm622_vm2, %v1471_v47, 0.0 }
 0x51e   : > { %v1473_v50 = vpop.eup %1472  ;;  %959 = vadd.xlane.f32.xlu0 %v958_v48 }
 0x51f   : > { %v961_v51 = vsel %vm622_vm2, %v1473_v50, 0.0 }
 0x520   : > { %962 = vadd.xlane.f32.xlu1 %v961_v51 }
 0x59f   : > { %v802_v57 = vpop.xlane.xlu0 %801 }
 0x5a0   : > { %1474 = vrcp.f32 %v802_v57 }
 0x5a1   : > { %v805_v58 = vpop.xlane.xlu1 %804 }
 0x5a2   : > { %1476 = vrcp.f32 %v805_v58 }
 0x5a3   : > { %v808_v59 = vpop.xlane.xlu0 %807 }
 0x5a4   : > { %1478 = vrcp.f32 %v808_v59 }
 0x5a5   : > { %v811_v60 = vpop.xlane.xlu1 %810 }
 0x5a6   : > { %1480 = vrcp.f32 %v811_v60 }
 0x5a7   : > { %v954_v61 = vpop.xlane.xlu0 %953 }
 0x5a8   : > { %1482 = vrcp.f32 %v954_v61 }
 0x5a9   : > { %v957_v62 = vpop.xlane.xlu1 %956 }
 0x5aa   : > { %v1475_v63 = vpop.eup %1474  ;;  %1484 = vrcp.f32 %v957_v62 }
 0x5ab   : > { %v960_v0 = vpop.xlane.xlu0 %959  ;;  %v813_v3 = vmul.f32 %v1475_v63, %v1459_v28 }
 0x5ac   : > { %v1477_v1 = vpop.eup %1476  ;;  %1486 = vrcp.f32 %v960_v0 }
 0x5ad   : > { %v963_v2 = vpop.xlane.xlu1 %962  ;;  %v815_v4 = vmul.f32 %v1477_v1, %v1461_v32 }
 0x5ae   : > { %v1479_v5 = vpop.eup %1478  ;;  %1488 = vrcp.f32 %v963_v2 }
 0x5af   : > { %v820_v6 = vpack.c.bf16 %v815_v4, %v813_v3  ;;  %v817_v8 = vmul.f32 %v1479_v5, %v1463_v35 }
 0x5b0   : > { %v1481_v7 = vpop.eup %1480 }
 0x5b1   : > { %v819_v9 = vmul.f32 %v1481_v7, %v1465_v39  ;;  %1317 = vmatprep.mubr.msk.bf16.mxu0 %vm622_vm2, %v820_v6 }
 0x5b2   : > { %v1483_v10 = vpop.eup %1482 }
 0x5b3   : > { %v821_v11 = vpack.c.bf16 %v819_v9, %v817_v8  ;;  %v965_v13 = vmul.f32 %v1483_v10, %v1467_v41 }
 0x5b4   : > { %v1485_v12 = vpop.eup %1484 }
 0x5b5   : > { %1318 = vmatmul.mubr.msk.bf16.vlgmr.msra.gmra.mrb[4].mxu0 %vm622_vm2, %v821_v11  ;;  %v967_v14 = vmul.f32 %v1485_v12, %v1469_v43 }
 0x5b6   : > { %v1487_v15 = vpop.eup %1486  ;;  %1328 = vmatpush3.bf16.msra.mxu0 %v974_v49 }
 0x5b7   : > { %v972_v16 = vpack.c.bf16 %v967_v14, %v965_v13  ;;  %v969_v18 = vmul.f32 %v1487_v15, %v1471_v47 }
 0x5b8   : > { %v1489_v17 = vpop.eup %1488 }
 0x5b9   : > { %v971_v19 = vmul.f32 %v1489_v17, %v1473_v50  ;;  %1329 = vmatprep.mubr.msk.bf16.mxu0 %vm622_vm2, %v972_v16 }
 0x5bb   : > { %v973_v22 = vpack.c.bf16 %v971_v19, %v969_v18 }
 0x5bd   : > { %1330 = vmatmul.mubr.msk.bf16.vlgmr.msra.gmra.mrb[8].mxu0 %vm622_vm2, %v973_v22 }
 0x688   : > { %v1319_v23 = vpop.f32.mrb[4].mxu0 }
 0x689   : > { %v1050_v24 = vadd.f32 %v1319_v23, %v1969_v36  ;;  %v863_v25 = vpop.f32.mrb[5].mxu0 }
 0x68a   : > { %v1030_v26 = vadd.f32 %v863_v25, %v1943_v44  ;;  %v1320_v27 = vpop.f32.mrb[6].mxu0 }
 0x68b   : > { %1052 = vst [vmem:[#allocation12 + $0x8] sm:$0xff] %v1050_v24  ;;  %v1051_v28 = vadd.f32 %v1320_v27, %v1971_v37  ;;  %v866_v29 = vpop.f32.mrb[7].mxu0 }
 0x68c   : > { %1032 = vst [vmem:[#allocation9] sm:$0xff] %v1030_v26  ;;  %v1031_v30 = vadd.f32 %v866_v29, %v1945_v45 }
 0x68d   : > { %1053 = vst [vmem:[#allocation12 + $0x18] sm:$0xff] %v1051_v28 }
 0x68e   : > { %1033 = vst [vmem:[#allocation9 + $0x10] sm:$0xff] %v1031_v30 }
 0x690   : > { %v1331_v31 = vpop.f32.mrb[8].mxu0 }
 0x691   : > { %v1042_v32 = vadd.f32 %v1331_v31, %v1963_v20  ;;  %v1015_v33 = vpop.f32.mrb[9].mxu0 }
 0x692   : > { %v1034_v34 = vadd.f32 %v1015_v33, %v1943_v44  ;;  %v1332_v36 = vpop.f32.mrb[10].mxu0 }
 0x693   : > { %1044 = vst [vmem:[#allocation10 + $0x8] sm:$0xff] %v1042_v32  ;;  %v1043_v35 = vadd.f32 %v1332_v36, %v1965_v21  ;;  %v1018_v38 = vpop.f32.mrb[11].mxu0 }
 0x694   : > { %1036 = vst [vmem:[#allocation9 + $0x8] sm:$0xff] %v1034_v34  ;;  %v1035_v37 = vadd.f32 %v1018_v38, %v1945_v45 }
 0x695   : > { %1045 = vst [vmem:[#allocation10 + $0x18] sm:$0xff] %v1043_v35 }
 0x696   : > { %1037 = vst [vmem:[#allocation9 + $0x18] sm:$0xff] %v1035_v37 }
 0x697 PF: > { %p1366_p1 = scmp.eq.s32.totalorder %s1771_s22, 2  ;;  %s1717_s14 = smov [#allocation10]  }
 0x698   : > { %s1073_s17 = sshll.u32 %s1717_s14, 4  ;;  %s1718_s24 = smov [#allocation9]   ;;  %s1074_s17 = int_to_ptr.vmem [resolvable:$true] %s1073_s17 }
 0x699   : > { %s1060_s16 = sshll.u32 %s1718_s24, 4  ;;  %s1580_s25 = scalar_lea.vmem %s1074_s17, 512  ;;  %s1061_s16 = int_to_ptr.vmem [resolvable:$true] %s1060_s16 }
 0x69a   : > { %p1581_p13 = scmp.ne.s32.totalorder %s1074_s17, %s1580_s25  ;;  %p1587_p3 = scmp.lt.s32.totalorder %s1074_s17, %s1074_s17 }
 0x69b   : > { %p1588_p5 = scmp.lt.s32.totalorder %s1580_s25, %s1580_s25 }
 0x69c   : > { %p1582_p7 = pnand %p1581_p13, %p1366_p1 }
 0x69d   : > { %p1589_p6 = por %p1588_p5, %p1587_p3 }
 0x69e   : > { %p1583_p2 = pneg %p1582_p7 }
 0x6a0   : > { %p1590_p9 = pnand %p1589_p6, %p1583_p2 }
 0x6a2   : > { %1593 = shalt.err (!%p1590_p9)
}
 0x6a3   : > { %s1594_s30 = scalar_lea.hbm %s2100_s4, 512 }
 0x6a4   : > { %p1595_p4 = scmp.ne.s32.totalorder %s2100_s4, %s1594_s30  ;;  %p1600_p10 = scmp.lt.u32.totalorder %s1594_s30, %s2100_s4 }
 0x6a6   : > { %p1596_p0 = pnand %p1595_p4, %p1366_p1 }
 0x6a8   : > { %p1597_p12 = pneg %p1596_p0 }
 0x6aa   : > { %p1602_p11 = pnand %p1600_p10, %p1597_p12 }
 0x6ac   : > { %1605 = shalt.err (!%p1602_p11)
}
 0x6ad   : > { %s1719_s1 = smov 256   ;;  %s1720_s20 = smov 16  }
 0x6ae   : > { %1346 = dma.vmem_to_hbm [thread:$0]  (%p1366_p1), %s1074_s17, 512, %s2100_s4, [#allocation11], %s1719_s1, %s1719_s1, %s1720_s20  }
 0x6af   : > { %s1606_s29 = scalar_lea.vmem %s1061_s16, 512  ;;  %p1613_p2 = scmp.lt.s32.totalorder %s1061_s16, %s1061_s16 }
 0x6b0   : > { %p1607_p8 = scmp.ne.s32.totalorder %s1061_s16, %s1606_s29  ;;  %p1614_p3 = scmp.lt.s32.totalorder %s1606_s29, %s1606_s29 }
 0x6b2   : > { %p1608_p13 = pnand %p1607_p8, %p1366_p1  ;;  %p1615_p5 = por %p1614_p3, %p1613_p2 }
 0x6b4   : > { %p1609_p7 = pneg %p1608_p13 }
 0x6b6   : > { %p1616_p6 = pnand %p1615_p5, %p1609_p7 }
 0x6b8   : > { %1619 = shalt.err (!%p1616_p6)
}
 0x6b9   : > { %s1620_s10 = scalar_lea.hbm %s2099_s3, 512 }
 0x6ba   : > { %p1621_p9 = scmp.ne.s32.totalorder %s2099_s3, %s1620_s10  ;;  %p1626_p12 = scmp.lt.u32.totalorder %s1620_s10, %s2099_s3 }
 0x6bc   : > { %p1622_p4 = pnand %p1621_p9, %p1366_p1 }
 0x6be   : > { %p1623_p0 = pneg %p1622_p4 }
 0x6c0   : > { %p1628_p10 = pnand %p1626_p12, %p1623_p0 }
 0x6c2   : > { %1631 = shalt.err (!%p1628_p10)
}
 0x6c3   : > { %1344 = dma.vmem_to_hbm [thread:$0]  (%p1366_p1), %s1061_s16, 512, %s2099_s3, [#allocation5], %s1719_s1, %s1719_s1, %s1720_s20  }
 0x6c4   : > { %s1721_s24 = smov [#allocation12]  }
 0x6c5   : > { %s1086_s25 = sshll.u32 %s1721_s24, 4  ;;  %s1087_s25 = int_to_ptr.vmem [resolvable:$true] %s1086_s25 }
 0x6c6   : > { %s1632_s6 = scalar_lea.vmem %s1087_s25, 512  ;;  %p1639_p7 = scmp.lt.s32.totalorder %s1087_s25, %s1087_s25 }
 0x6c7   : > { %p1633_p11 = scmp.ne.s32.totalorder %s1087_s25, %s1632_s6  ;;  %p1640_p2 = scmp.lt.s32.totalorder %s1632_s6, %s1632_s6 }
 0x6c9   : > { %p1634_p8 = pnand %p1633_p11, %p1366_p1  ;;  %p1641_p3 = por %p1640_p2, %p1639_p7 }
 0x6cb   : > { %p1635_p13 = pneg %p1634_p8 }
 0x6cd   : > { %p1642_p5 = pnand %p1641_p3, %p1635_p13 }
 0x6cf   : > { %1645 = shalt.err (!%p1642_p5)
}
 0x6d0   : > { %s1646_s21 = scalar_lea.hbm %s2101_s5, 512 }
 0x6d1   : > { %p1647_p6 = scmp.ne.s32.totalorder %s2101_s5, %s1646_s21  ;;  %p1652_p0 = scmp.lt.u32.totalorder %s1646_s21, %s2101_s5 }
 0x6d3   : > { %p1648_p9 = pnand %p1647_p6, %p1366_p1 }
 0x6d5   : > { %p1649_p4 = pneg %p1648_p9 }
 0x6d7   : > { %p1654_p12 = pnand %p1652_p0, %p1649_p4 }
 0x6d9   : > { %1657 = shalt.err (!%p1654_p12)
}
 0x6da   : > { %1348 = dma.vmem_to_hbm [thread:$0]  (%p1366_p1), %s1087_s25, 512, %s2101_s5, [#allocation11], %s1719_s1, %s1719_s1, %s1720_s20  }
 0x6db   : > { %1683 = dma.done.wait (%p1366_p1), [#allocation5], 512  }
 0x6dc   : > { %1685 = vsyncadd (%p1366_p1), [#allocation5], 4294966784 }
 0x6dd   : > { %1687 = dma.done.wait (%p1366_p1), [#allocation11], 1024  }
 0x6de   : > { %1689 = vsyncadd (%p1366_p1), [#allocation11], 4294966272 }
 0x6df PF: > { %s2119_s29 = sld [smem:[#allocation17_spill]]  ;;  %s2120_s20 = sld [smem:[#allocation18_spill]] }
 0x6e0   : > { %p21_p10 = scmp.ge.s32.totalorder %s1774_s23, 5   ;;  %s2121_s18 = smov %s1696_s19 }
 0x6e1   : > { %s2123_s21 = smov %s1774_s23 }
 0x6e2   :  { %23 = sbr.rel (!%p21_p10) target bundleno = 10 (0xa), region = 116 }
 0x6e5   : > { %s2122_s19 = smov %s2119_s29 }
 0x6e9   :  { %1110 = vsyncpa [#allocation4], 1 }
 0x6ea   :  { %1112 = vsyncpa [#allocation4 + $0x1], 1 }
 0x6eb   :  { %1113 = vsyncpa [#allocation7], 1 }
 0x6ec   :  { %1115 = vsyncpa [#allocation7 + $0x1], 1 }
 0x6ed   :  { %1116 = vsyncpa [#allocation5], 1 }
 0x6ee   :  { %1118 = vsyncpa [#allocation5 + $0x1], 1 }
 0x6ef   :  { %1119 = vsyncpa [#allocation11], 1 }

</bundles_post_ra>
